<compile_context>
chip_gen: v5e
topology: v5e:2x2
jax: 0.10.0
libtpu: 0.0.40
codegen_flags: <defaults>
</compile_context>

<pallas_src>
import functools
from typing import NamedTuple

import jax
import jax.numpy as jnp
from jax.experimental import pallas as pl
from jax.experimental.pallas import tpu as pltpu


# ----------------------------------------------------------------------------
# Activation epilogue (VPU / EUP, computed in f32)
# ----------------------------------------------------------------------------
def _apply_activation(y, activation):
    if activation == "relu":
        return jnp.maximum(y, 0.0)
    elif activation == "lrelu":
        # LinearBlock explicitly uses nn.LeakyReLU(0.2).
        return jnp.where(y >= 0.0, y, 0.2 * y)
    elif activation == "tanh":
        return jnp.tanh(y)
    elif activation == "elu":
        # nn.ELU() default alpha = 1.0.
        return jnp.where(y >= 0.0, y, jnp.expm1(y))
    elif activation == "none":
        return y
    else:
        raise ValueError(f"Unsupported activation: {activation}")


# ----------------------------------------------------------------------------
# Kernels
# ----------------------------------------------------------------------------
def _kernel_weight_resident(x_ref, w_ref, b_ref, o_ref, *, activation):
    # grid = (M tiles,). Weight/bias blocks have constant index maps -> resident.
    y = jnp.dot(x_ref[...], w_ref[...], preferred_element_type=jnp.float32)
    y = _apply_activation(y + b_ref[...], activation)
    o_ref[...] = y.astype(o_ref.dtype)


def _kernel_ksplit_accum_in_out(x_ref, w_ref, b_ref, o_ref, *, activation):
    # grid = (M, N, K); K last ("arbitrary"); f32 output block is the accumulator.
    k = pl.program_id(2)

    @pl.when(k == 0)
    def _():
        o_ref[...] = jnp.zeros_like(o_ref)

    o_ref[...] += jnp.dot(x_ref[...], w_ref[...], preferred_element_type=jnp.float32)

    @pl.when(k == pl.num_programs(2) - 1)
    def _():
        o_ref[...] = _apply_activation(o_ref[...] + b_ref[...], activation)


def _kernel_ksplit_scratch(x_ref, w_ref, b_ref, o_ref, acc_ref, *, activation):
    # Same as above but for non-f32 output dtypes: accumulate in a VMEM scratch.
    k = pl.program_id(2)

    @pl.when(k == 0)
    def _():
        acc_ref[...] = jnp.zeros_like(acc_ref)

    acc_ref[...] += jnp.dot(x_ref[...], w_ref[...], preferred_element_type=jnp.float32)

    @pl.when(k == pl.num_programs(2) - 1)
    def _():
        y = _apply_activation(acc_ref[...] + b_ref[...], activation)
        o_ref[...] = y.astype(o_ref.dtype)


# ----------------------------------------------------------------------------
# Tiling helpers
# ----------------------------------------------------------------------------
def _round_up(x, m):
    return ((x + m - 1) // m) * m


def _largest_divisor_tile(padded_dim, candidates):
    for c in candidates:
        if padded_dim % c == 0:
            return c
    return padded_dim


def _choose_tm(M, sub, fits):
    """Largest M-tile (multiple of the sublane packing `sub`) that fits VMEM and
    wastes at most ~30% padded rows; otherwise the smallest fitting tile."""
    cands = [c for c in (512, 256, 128, 64, 32, 16, 8)
             if c % sub == 0 and fits(c)]
    if not cands:
        return None
    for c in cands:
        if (_round_up(M, c) - M) / max(M, 1) <= 0.30:
            return c
    return cands[-1]


def _vmem_budget_bytes():
    """Per-generation VMEM budget (leaves headroom for compiler scratch)."""
    try:
        cap = int(pltpu.get_tpu_info().vmem_capacity_bytes)
    except Exception:
        cap = 64 << 20  # conservative default: v7x has 64 MiB per TensorCore
    return max(32 << 20, (cap * 3) // 4)


# ----------------------------------------------------------------------------
# Parameter preparation (static per layer; do this once outside the hot path)
# ----------------------------------------------------------------------------
class LinearBlockParams(NamedTuple):
    w: jax.Array      # (K_pad, N_pad) in compute dtype
    b: jax.Array      # (1, N_pad) float32
    in_dim: int
    out_dim: int


def prepare_linear_block_params(w, b, *, compute_dtype=jnp.bfloat16):
    """Cast + zero-pad the static per-layer parameters once.

    w: (in_dim, out_dim)  (transposed PyTorch weight), b: (out_dim,)
    compute_dtype: MXU operand dtype (default bf16; pass None to keep f32).
    """
    K, N = w.shape
    assert b.shape == (N,)
    K_pad = _round_up(K, 128)
    N_pad = _round_up(N, 128)
    wc = w.astype(compute_dtype) if compute_dtype is not None else w
    if (K_pad, N_pad) != (K, N):
        wc = jnp.pad(wc, ((0, K_pad - K), (0, N_pad - N)))
    b2 = jnp.pad(b.astype(jnp.float32), (0, N_pad - N)).reshape(1, N_pad)
    return LinearBlockParams(w=wc, b=b2, in_dim=K, out_dim=N)


# ----------------------------------------------------------------------------
# Forward
# ----------------------------------------------------------------------------
def linear_block_apply(x, params, *, activation="relu", norm="none",
                       force_ksplit=False):
    """LinearBlock.forward (fc -> activation) for norm='none'."""
    if norm != "none":
        # TODO(synk): 'bn'/'in' normalization paths not implemented (module default is norm='none').
        raise NotImplementedError("Only norm='none' is implemented")

    M, K = x.shape
    assert K == params.in_dim, (K, params.in_dim)
    K_pad, N_pad = params.w.shape
    N = params.out_dim
    out_dtype = x.dtype
    compute_dtype = params.w.dtype
    in_isz = jnp.dtype(compute_dtype).itemsize
    out_isz = jnp.dtype(out_dtype).itemsize
    sub = 8 if in_isz >= 4 else (16 if in_isz == 2 else 32)  # sublane packing

    budget = _vmem_budget_bytes()

    # Only cast / pad x when actually needed (avoid extra HBM round trips).
    xc = x.astype(compute_dtype) if x.dtype != compute_dtype else x
    if K_pad != K:
        xc = jnp.pad(xc, ((0, 0), (0, K_pad - K)))

    transc = M * N if activation in ("tanh", "elu") else 0
    cost = pl.CostEstimate(
        flops=2 * M * N_pad * K_pad,
        transcendentals=transc,
        bytes_accessed=(M * K_pad * in_isz + K_pad * N_pad * in_isz
                        + N_pad * 4 + M * N_pad * out_isz),
    )

    # ---- fast path: weight resident in VMEM, no K axis, no accumulator -----
    def fast_est(tm_):
        # conservative: assume everything is double-buffered
        return (2 * (tm_ * K_pad + K_pad * N_pad + N_pad) * in_isz
                + 2 * tm_ * N_pad * out_isz)

    tm_fast = None
    if not force_ksplit:
        tm_fast = _choose_tm(M, sub, fits=lambda c: fast_est(c) <= budget)

    if tm_fast is not None:
        tm = tm_fast
        M_pad = _round_up(M, tm)
        xp = jnp.pad(xc, ((0, M_pad - M), (0, 0))) if M_pad != M else xc
        vmem_limit = int(min(budget, max(int(1.5 * fast_est(tm)), 32 << 20)))

        out_padded = pl.pallas_call(
            functools.partial(_kernel_weight_resident, activation=activation),
            out_shape=jax.ShapeDtypeStruct((M_pad, N_pad), out_dtype),
            grid_spec=pltpu.PrefetchScalarGridSpec(
                num_scalar_prefetch=0,
                grid=(M_pad // tm,),
                in_specs=[
                    pl.BlockSpec((tm, K_pad), lambda i: (i, 0)),     # x tile
                    pl.BlockSpec((K_pad, N_pad), lambda i: (0, 0)),  # full weight, resident
                    pl.BlockSpec((1, N_pad), lambda i: (0, 0)),      # bias, resident
                ],
                out_specs=pl.BlockSpec((tm, N_pad), lambda i: (i, 0)),
            ),
            compiler_params=pltpu.CompilerParams(
                dimension_semantics=("parallel",),
                vmem_limit_bytes=vmem_limit,
            ),
            cost_estimate=cost,
        )(xp, params.w, params.b)
        return out_padded[:M, :N]

    # ---- K-split path (large layers): (M, N, K) grid, K innermost ----------
    accumulate_in_out = out_dtype == jnp.float32

    tm = _choose_tm(M, sub, fits=lambda c: True)
    tn = _largest_divisor_tile(N_pad, (1024, 512, 256, 128))
    tk = _largest_divisor_tile(K_pad, (1024, 512, 256, 128))

    def ksplit_est(tm_, tn_, tk_):
        est = (2 * (tm_ * tk_ + tk_ * tn_ + tn_) * in_isz
               + 2 * tm_ * tn_ * out_isz)
        if not accumulate_in_out:
            est += tm_ * tn_ * 4
        return est

    for _ in range(32):  # shrink tiles until they fit the VMEM budget
        if ksplit_est(tm, tn, tk) <= budget:
            break
        if tn >= tk and tn > 256:
            tn //= 2
        elif tk > 256:
            tk //= 2
        elif tn > 128:
            tn //= 2
        elif tk > 128:
            tk //= 2
        elif tm > sub:
            tm = max(sub, tm // 2)
        else:
            break

    M_pad = _round_up(M, tm)
    xp = jnp.pad(xc, ((0, M_pad - M), (0, 0))) if M_pad != M else xc
    grid = (M_pad // tm, N_pad // tn, K_pad // tk)
    vmem_limit = int(min(budget, max(int(1.5 * ksplit_est(tm, tn, tk)), 32 << 20)))

    if accumulate_in_out:
        kernel = functools.partial(_kernel_ksplit_accum_in_out, activation=activation)
        scratch = []
    else:
        kernel = functools.partial(_kernel_ksplit_scratch, activation=activation)
        scratch = [pltpu.VMEM((tm, tn), jnp.float32)]

    out_padded = pl.pallas_call(
        kernel,
        out_shape=jax.ShapeDtypeStruct((M_pad, N_pad), out_dtype),
        grid_spec=pltpu.PrefetchScalarGridSpec(
            num_scalar_prefetch=0,
            grid=grid,
            in_specs=[
                pl.BlockSpec((tm, tk), lambda i, j, k: (i, k)),   # x tile
                pl.BlockSpec((tk, tn), lambda i, j, k: (k, j)),   # weight tile
                pl.BlockSpec((1, tn), lambda i, j, k: (0, j)),    # bias tile
            ],
            out_specs=pl.BlockSpec((tm, tn), lambda i, j, k: (i, j)),
            scratch_shapes=scratch,
        ),
        compiler_params=pltpu.CompilerParams(
            dimension_semantics=("parallel", "parallel", "arbitrary"),
            vmem_limit_bytes=vmem_limit,
        ),
        cost_estimate=cost,
    )(xp, params.w, params.b)
    return out_padded[:M, :N]


def linear_block(x, w, b, *, activation="relu", norm="none",
                 compute_dtype=jnp.bfloat16, force_ksplit=False):
    """Convenience wrapper: prepares params then applies the kernel."""
    params = prepare_linear_block_params(w, b, compute_dtype=compute_dtype)
    return linear_block_apply(x, params, activation=activation, norm=norm,
                              force_ksplit=force_ksplit)


# ----------------------------------------------------------------------------
# Reference + self-test
# ----------------------------------------------------------------------------
def reference_linear_block(x, w, b, activation="relu", compute_dtype=None):
    if compute_dtype is not None:
        x = x.astype(compute_dtype).astype(jnp.float32)
        w = w.astype(compute_dtype).astype(jnp.float32)
    y = jnp.dot(x, w, precision=jax.lax.Precision.HIGHEST) + b.reshape(1, -1)
    return _apply_activation(y, activation)


if __name__ == "__main__":
    base_key = jax.random.PRNGKey(0)

    def run_case(case_id, batch, in_dim, out_dim, activation, *,
                 compute_dtype=jnp.bfloat16, force_ksplit=False, tol=1e-4):
        kx, kw, kb = jax.random.split(jax.random.fold_in(base_key, case_id), 3)
        x = jax.random.normal(kx, (batch, in_dim), dtype=jnp.float32)
        # nn.Linear-style init: uniform(-1/sqrt(in_dim), 1/sqrt(in_dim))
        bound = 1.0 / jnp.sqrt(in_dim)
        w_pt = jax.random.uniform(kw, (out_dim, in_dim), minval=-bound, maxval=bound,
                                  dtype=jnp.float32)   # PyTorch layout (out, in)
        b = jax.random.uniform(kb, (out_dim,), minval=-bound, maxval=bound,
                               dtype=jnp.float32)
        w = w_pt.T                                      # kernel layout (in, out)

        out = jax.block_until_ready(
            linear_block(x, w, b, activation=activation, norm="none",
                         compute_dtype=compute_dtype, force_ksplit=force_ksplit))
        ref = reference_linear_block(x, w, b, activation, compute_dtype=compute_dtype)
        assert out.shape == (batch, out_dim)
        max_err = float(jnp.max(jnp.abs(out - ref)))
        assert jnp.allclose(out, ref, atol=tol, rtol=tol), (
            f"mismatch vs reference (case {case_id}, act={activation}, "
            f"max abs err {max_err})")

    # Small nn.Linear(32, 64), bf16 MXU operands, weight-resident fast path.
    run_case(0, batch=8, in_dim=32, out_dim=64, activation="relu")
    # Non-multiple batch/features: exercises M-tile waste heuristic + padding.
    run_case(1, batch=300, in_dim=300, out_dim=300, activation="tanh", tol=2e-4)
    # Pure f32 operand path (compute_dtype=None keeps f32 on the MXU).
    run_case(2, batch=16, in_dim=128, out_dim=128, activation="lrelu",
             compute_dtype=None, tol=1e-4)
    # Force the K-split path (accumulate directly into the f32 output block).
    run_case(3, batch=48, in_dim=384, out_dim=256, activation="none",
             force_ksplit=True, tol=2e-4)

    print("KERNEL_OK")
</pallas_src>

<mosaic_0001>
module attributes {stable_mosaic.version = 11 : i64} {
  func.func @_kernel_weight_resident(%arg0: i32, %arg1: memref<16x128xbf16, #tpu.memory_space<vmem>>, %arg2: memref<128x128xbf16, #tpu.memory_space<vmem>>, %arg3: memref<1x128xf32, #tpu.memory_space<vmem>>, %arg4: memref<16x128xf32, #tpu.memory_space<vmem>>) attributes {dimension_semantics = [#tpu.dimension_semantics<parallel>], iteration_bounds = array<i64: 1>, scalar_prefetch = 0 : i64, scratch_operands = 0 : i64, tpu.core_type = #tpu.core_type<tc>, window_params = [{transform_indices = @transform_0, window_bounds = array<i64: 16, 128>}, {pipeline_mode = #tpu.pipeline_mode<synchronous>, transform_indices = @transform_1, window_bounds = array<i64: 128, 128>}, {pipeline_mode = #tpu.pipeline_mode<synchronous>, transform_indices = @transform_2, window_bounds = array<i64: 1, 128>}, {transform_indices = @transform_3, window_bounds = array<i64: 16, 128>}]} {
    %c0 = arith.constant 0 : index
    %c0_0 = arith.constant 0 : index
    %0 = vector.load %arg1[%c0, %c0_0] : memref<16x128xbf16, #tpu.memory_space<vmem>>, vector<16x128xbf16>
    %c0_1 = arith.constant 0 : index
    %c0_2 = arith.constant 0 : index
    %1 = vector.load %arg2[%c0_1, %c0_2] : memref<128x128xbf16, #tpu.memory_space<vmem>>, vector<128x128xbf16>
    %cst = arith.constant dense<0.000000e+00> : vector<16x128xf32>
    %2 = tpu.matmul %0, %1, %cst {dimension_numbers = #tpu.dot_dimension_numbers<[1], [0], [0], [1], [0, 0, 1, 1], [], []>} : vector<16x128xbf16>, vector<128x128xbf16>, vector<16x128xf32> -> vector<16x128xf32>
    %c0_3 = arith.constant 0 : index
    %c0_4 = arith.constant 0 : index
    %3 = vector.load %arg3[%c0_3, %c0_4] : memref<1x128xf32, #tpu.memory_space<vmem>>, vector<1x128xf32>
    %4 = vector.broadcast %3 : vector<1x128xf32> to vector<16x128xf32>
    %5 = arith.addf %2, %4 : vector<16x128xf32>
    %cst_5 = arith.constant 0.000000e+00 : f32
    %6 = vector.broadcast %cst_5 : f32 to vector<16x128xf32>
    %7 = arith.maximumf %5, %6 : vector<16x128xf32>
    %c0_6 = arith.constant 0 : index
    %c0_7 = arith.constant 0 : index
    %8 = vector.load %arg4[%c0_6, %c0_7] : memref<16x128xf32, #tpu.memory_space<vmem>>, vector<16x128xf32>
    tpu.vector_store %arg4[%c0_6, %c0_7], %7 {strides = array<i32>} : memref<16x128xf32, #tpu.memory_space<vmem>>, vector<16x128xf32>,
    return
  }
  func.func @transform_0(%arg0: i32) -> (i32, i32) {
    %c0_i32 = arith.constant 0 : i32
    %c0_i32_0 = arith.constant 0 : i32
    return %arg0, %c0_i32 : i32, i32
  }
  func.func @transform_1(%arg0: i32) -> (i32, i32) {
    %c0_i32 = arith.constant 0 : i32
    %c0_i32_0 = arith.constant 0 : i32
    %c0_i32_1 = arith.constant 0 : i32
    return %c0_i32, %c0_i32_0 : i32, i32
  }
  func.func @transform_2(%arg0: i32) -> (i32, i32) {
    %c0_i32 = arith.constant 0 : i32
    %c0_i32_0 = arith.constant 0 : i32
    %c0_i32_1 = arith.constant 0 : i32
    return %c0_i32, %c0_i32_0 : i32, i32
  }
  func.func @transform_3(%arg0: i32) -> (i32, i32) {
    %c0_i32 = arith.constant 0 : i32
    %c0_i32_0 = arith.constant 0 : i32
    return %arg0, %c0_i32 : i32, i32
  }
}

</mosaic_0001>

<bundles_post_ra>
// kernel: tpu_custom_call.1
= control target key start
LH: loop header
LB: loop body
LE: loop exit
PB: predicated region body
PF: predicated region fallthrough
CT: control target
= control target key end

     0   :  { %8 = vsyncpa [#allocation3], 0  ;;  %s331_s0 = inlined_call_operand.hbm [shape: bf16[16,128], index: 0, kind: input, shape index: {}]   ;;  %s332_s1 = inlined_call_operand.hbm [shape: bf16[128,128], index: 1, kind: input, shape index: {}]   ;;  %s333_s2 = inlined_call_operand.vmem [shape: f32[1,128], index: 2, kind: input, shape index: {}]   ;;  %s334_s3 = inlined_call_operand.hbm [shape: f32[16,128], index: 3, kind: output, shape index: {}]  }
   0x1   :  { %9 = vsyncpa [#allocation6], 0 }
   0x2   :  { %10 = vsyncpa [#allocation4], 0  ;;  %s15_s14 = sshll.u32 %s331_s0, 4  ;;  %s292_s15 = smov [#allocation2]   ;;  %s16_s14 = int_to_ptr.hbm [resolvable:$true] %s15_s14 }
   0x3   :  { %s17_s16 = sshll.u32 %s292_s15, 4  ;;  %s28_s19 = sshll.u32 %s332_s1, 4  ;;  %s18_s16 = int_to_ptr.vmem [resolvable:$true] %s17_s16  ;;  %s29_s19 = int_to_ptr.hbm [resolvable:$true] %s28_s19 }
   0x4   :  { %s293_s20 = smov 64   ;;  %s294_s21 = smov 4  }
   0x5   :  { %23 = dma.hbm_to_vmem [thread:$0]  %s16_s14, 128, %s18_s16, [#allocation3], %s293_s20, %s293_s20, %s294_s21  }
   0x6   :  { %s295_s22 = smov [#allocation5]  }
   0x7   :  { %s30_s23 = sshll.u32 %s295_s22, 4  ;;  %s31_s23 = int_to_ptr.vmem [resolvable:$true] %s30_s23 }
   0x8   :  { %36 = dma.hbm_to_vmem [thread:$0]  %s29_s19, 1024, %s31_s23, [#allocation6], %s293_s20, %s293_s20, %s294_s21  }
   0x9   :  { %286 = dma.done.wait [#allocation3], 128  }
   0xa   :  { %287 = vsyncadd [#allocation3], 4294967168 }
   0xb   :  { %288 = dma.done.wait [#allocation6], 1024  }
   0xc   :  { %289 = vsyncadd [#allocation6], 4294966272  ;;  %v205_v0 = vld [vmem:[#allocation5 + $0x38] sm:$0xff]  ;;  %v204_v1 = vld [vmem:[#allocation5 + $0x30] sm:$0xff]  ;;  %s296_s24 = smov [#allocation7]   ;;  %s147_s28 = sshll.u32 %s334_s3, 4  ;;  %s148_s28 = int_to_ptr.hbm [resolvable:$true] %s147_s28 }
   0xd   :  { %123 = vmatpush.bf16.msra.mxu0 %v205_v0  ;;  %v203_v2 = vld [vmem:[#allocation5 + $0x28] sm:$0xff]  ;;  %v202_v3 = vld [vmem:[#allocation5 + $0x20] sm:$0xff]  ;;  %v201_v4 = vld [vmem:[#allocation5 + $0x18] sm:$0xff]  ;;  %s145_s25 = sshll.u32 %s296_s24, 4  ;;  %s297_s29 = smov 128   ;;  %s146_s25 = int_to_ptr.vmem [resolvable:$true] %s145_s25 }
   0xe   :  { %v200_v5 = vld [vmem:[#allocation5 + $0x10] sm:$0xff]  ;;  %v199_v6 = vld [vmem:[#allocation5 + $0x8] sm:$0xff]  ;;  %v198_v7 = vld [vmem:[#allocation5] sm:$0xff]  ;;  %s298_s30 = smov 8  }
   0xf   :  { %v197_v8 = vld [vmem:[#allocation2] sm:$0xff] }
  0x10   :  { %v213_v9 = vld [vmem:[%s333_s2] ss:$0 sm:$0xff] }
  0x11   :  { %124 = vmatpush.bf16.msra.mxu0 %v204_v1 }
  0x15   :  { %125 = vmatpush.bf16.msra.mxu0 %v203_v2 }
  0x19   :  { %126 = vmatpush.bf16.msra.mxu0 %v202_v3 }
  0x1d   :  { %127 = vmatpush.bf16.msra.mxu0 %v201_v4 }
  0x21   :  { %128 = vmatpush.bf16.msra.mxu0 %v200_v5 }
  0x25   :  { %129 = vmatpush.bf16.msra.mxu0 %v199_v6 }
  0x29   :  { %130 = vmatpush.bf16.msra.mxu0 %v198_v7 }
  0x2c   :  { %131 = vmatmul.bf16.vlgmr.msra.gmra.mxu0 %v197_v8 }
  0xa9   :  { %v132_v10 = vpop.f32.mrf.mxu0 }
  0xaa   :  { %v133_v11 = vadd.f32 %v213_v9, %v132_v10 }
  0xac   :  { %v137_v12 = vmax.f32 %v133_v11, 0.0 }
  0xae   :  { %139 = vst [vmem:[#allocation7] sm:$0xff] %v137_v12 }
  0xb1   :  { %v134_v13 = vpop.f32.mrf.mxu0 }
  0xb2   :  { %v135_v14 = vadd.f32 %v213_v9, %v134_v13 }
  0xb4   :  { %v138_v15 = vmax.f32 %v135_v14, 0.0 }
  0xb6   :  { %140 = vst [vmem:[#allocation7 + $0x8] sm:$0xff] %v138_v15 }
  0xb7   :  { %153 = dma.vmem_to_hbm [thread:$0]  %s146_s25, 256, %s148_s28, [#allocation4], %s297_s29, %s297_s29, %s298_s30  }
  0xb8   :  { %290 = dma.done.wait [#allocation4], 256  }
  0xb9   :  { %291 = vsyncadd [#allocation4], 4294967040 }
  0xba   :  { %158 = vsyncpa [#allocation3], 1 }
  0xbb   :  { %159 = vsyncpa [#allocation6], 1 }
  0xbc   :  { %160 = vsyncpa [#allocation4], 1 }

</bundles_post_ra>
